<compile_context>
chip_gen: v6e
topology: v6e:2x2x1
jax: 0.10.0
libtpu: 0.0.40
codegen_flags: <defaults>
</compile_context>

<pallas_src>
import jax
import jax.numpy as jnp
from jax.experimental import pallas as pl
from jax.experimental.pallas import tpu as pltpu


def _drr_att_kernel(x0_ref, x1f_ref, wq_ref, bq_ref, wkv_ref, bkv_ref,
                    wo_ref, bo_ref, out_ref):
    """One batch-tile (TB users) of DRR-att.

    Q proj:        (TB,E)bf16    @ (E,E)bf16   -> f32   (scale pre-folded into Wq,bq)
    fused K|V:     (TB*T,E)bf16  @ (E,2E)bf16  -> f32   (single MXU pass)
    scores/ctx:    VPU broadcast-mul + XLU reduce (no M=1 batched matmuls)
    softmax:       f32 VPU + EUP approx reciprocal
    output:        out[0]=x0, out[1]=x0*att, out[2]=att  (fused concat, lane-dense)
    """
    x0 = x0_ref[...]                                    # (TB, E)    f32
    x1f = x1f_ref[...]                                  # (TB*T, E)  f32 (or bf16)
    tb, e = x0.shape
    t = x1f.shape[0] // tb

    # ---- in-projections on the MXU (bf16 operands, f32 accumulation) ----
    q = jnp.dot(x0.astype(jnp.bfloat16), wq_ref[...],
                preferred_element_type=jnp.float32) + bq_ref[...]           # (TB, E)

    kv = jnp.dot(x1f.astype(jnp.bfloat16), wkv_ref[...],
                 preferred_element_type=jnp.float32) + bkv_ref[...]         # (TB*T, 2E)
    k = kv[:, :e].reshape(tb, t, e)                                         # (TB, T, E)
    v = kv[:, e:].reshape(tb, t, e)                                         # (TB, T, E)

    # ---- scaled dot-product attention over the T items (VPU/XLU, MXU left idle) ----
    s = jnp.sum(q[:, None, :] * k, axis=-1)                                 # (TB, T)
    s = s - jnp.max(s, axis=-1, keepdims=True)
    p = jnp.exp(s)
    # NOTE: approx reciprocal (EUP) -> softmax rows sum to 1 only to ~1e-3 relative.
    p = p * pl.reciprocal(jnp.sum(p, axis=-1, keepdims=True), approx=True)  # (TB, T)

    ctx = jnp.sum(p[:, :, None] * v, axis=1)                                # (TB, E)
    att = jnp.dot(ctx.astype(jnp.bfloat16), wo_ref[...],
                  preferred_element_type=jnp.float32) + bo_ref[...]         # (TB, E)

    # torch.mean over the length-1 query dim is the identity on (TB, E).
    # ---- fused concat([x0, x0*att, att], dim=0): one (3, TB, E) store ----
    out_ref[0, :, :] = x0
    out_ref[1, :, :] = x0 * att
    out_ref[2, :, :] = att


def _choose_batch_tile(B, T, E, *, max_tile=256, vmem_budget_bytes=24 << 20):
    """Largest divisor of B (<= max_tile) whose per-step VMEM footprint fits the budget.

    Budget accounts for double-buffered x0/x1/out tiles, the f32 kv intermediate,
    small temporaries, and the resident bf16 weights (also counted double-buffered,
    since we do not request Buffered(1)).  24 MiB keeps us under the 32 MiB default
    scoped VMEM limit on every chip, including v7x's 64 MiB physical VMEM.
    """
    weight_bytes = 2 * 2 * (E * E + E * 2 * E + E * E)      # bf16, x2 buffers

    def step_bytes(tb):
        return 4 * (2 * tb * E              # x0 tile (x2 buffers)
                    + 2 * tb * T * E        # x1 tile (x2 buffers)
                    + 2 * 3 * tb * E        # output tile (x2 buffers)
                    + 2 * tb * T * E        # f32 kv intermediate
                    + 4 * tb * E)           # q / ctx / att / x0*att temporaries

    best = 1
    for tb in range(1, min(B, max_tile) + 1):
        if B % tb == 0 and step_bytes(tb) + weight_bytes <= vmem_budget_bytes:
            best = tb
    return best


def drr_att_sr(x0, x1, kparams):
    """Runs the Pallas kernel; only free reshapes remain in plain JAX."""
    B, E = x0.shape
    T = x1.shape[1]
    TB = _choose_batch_tile(B, T, E)
    nb = B // TB

    # Free, contiguous flatten so the kernel sees x1 already in matmul layout.
    x1f = x1.reshape(B * T, E)

    const2 = lambda i: (0, 0)
    cost = pl.CostEstimate(
        flops=int(2 * B * E * E            # Q proj
                  + 2 * B * T * E * 2 * E  # fused K|V proj
                  + 2 * B * T * E          # scores
                  + 2 * B * T * E          # context
                  + 2 * B * E * E          # out proj
                  + 6 * B * E),            # elementwise / softmax glue
        transcendentals=int(B * T + B),
        bytes_accessed=int(x0.nbytes + x1.nbytes                 # inputs
                           + 2 * (E * E + 2 * E * E + E * E)     # bf16 weights
                           + 4 * 4 * E                           # f32 biases
                           + 4 * 3 * B * E),                     # output
    )

    out = pl.pallas_call(
        _drr_att_kernel,
        out_shape=jax.ShapeDtypeStruct((3, B, E), jnp.float32),
        grid=(nb,),
        in_specs=[
            pl.BlockSpec((TB, E), lambda i: (i, 0)),          # x0 tile
            pl.BlockSpec((TB * T, E), lambda i: (i, 0)),      # x1 tile, pre-flattened
            pl.BlockSpec((E, E), const2),                     # Wq   (bf16, resident)
            pl.BlockSpec((1, E), const2),                     # bq
            pl.BlockSpec((E, 2 * E), const2),                 # [Wk|Wv] (bf16, resident)
            pl.BlockSpec((1, 2 * E), const2),                 # [bk|bv]
            pl.BlockSpec((E, E), const2),                     # Wo   (bf16, resident)
            pl.BlockSpec((1, E), const2),                     # bo
        ],
        out_specs=pl.BlockSpec((3, TB, E), lambda i: (0, i, 0)),
        compiler_params=pltpu.CompilerParams(
            dimension_semantics=("parallel",)),
        cost_estimate=cost,
    )(x0, x1f,
      kparams["wq"], kparams["bq"], kparams["wkv"], kparams["bkv"],
      kparams["wo"], kparams["bo"])

    # (3, B, E) row-major flatten == torch.flatten(torch.cat([x0, dot, att], dim=0))
    return out.reshape(-1)


def init_params(key, embedding_dim):
    """Deterministic init mirroring nn.MultiheadAttention(E, num_heads=1) shapes."""
    E = embedding_dim
    ks = jax.random.split(key, 6)
    in_proj_w = jax.random.normal(ks[0], (3 * E, E), jnp.float32) * 0.05
    in_proj_b = jax.random.normal(ks[1], (3 * E,), jnp.float32) * 0.05
    out_w = jax.random.normal(ks[2], (E, E), jnp.float32) * 0.05
    out_b = jax.random.normal(ks[3], (E,), jnp.float32) * 0.05
    # Unused in forward (see TODO(synk) above): nn.Conv1d(1, 1, 1) params.
    _wav_weight = jax.random.normal(ks[4], (1, 1, 1), jnp.float32) * 0.05
    _wav_bias = jax.random.normal(ks[5], (1,), jnp.float32) * 0.05

    wq, wk, wv = in_proj_w[:E], in_proj_w[E:2 * E], in_proj_w[2 * E:]
    bq, bk, bv = in_proj_b[:E], in_proj_b[E:2 * E], in_proj_b[2 * E:]

    f32_params = {"wq": wq, "wk": wk, "wv": wv, "wo": out_w,
                  "bq": bq, "bk": bk, "bv": bv, "bo": out_b}

    # Kernel params: pre-transposed (kernel does x @ W + b), K|V weights fused, the
    # attention 1/sqrt(E) scale folded into BOTH Wq and bq, and weight matrices
    # pre-cast to bf16 ONCE at init (persistent, no per-call cast).
    scale = 1.0 / jnp.sqrt(jnp.float32(E))
    kparams = {
        "wq": (wq.T * scale).astype(jnp.bfloat16),
        "wkv": jnp.concatenate([wk.T, wv.T], axis=1).astype(jnp.bfloat16),
        "wo": out_w.T.astype(jnp.bfloat16),
        "bq": (bq * scale).reshape(1, E),
        "bkv": jnp.concatenate([bk, bv]).reshape(1, 2 * E),
        "bo": out_b.reshape(1, E),
    }
    return kparams, f32_params


def _reference_bf16(x0, x1, kp):
    """Pure-JAX reference using the SAME bf16-in / f32-acc numerics as the kernel."""
    e = x0.shape[-1]
    bf = jnp.bfloat16
    q = jnp.dot(x0.astype(bf), kp["wq"], preferred_element_type=jnp.float32) + kp["bq"]
    kv = jnp.dot(x1.reshape(-1, e).astype(bf), kp["wkv"],
                 preferred_element_type=jnp.float32) + kp["bkv"]
    k = kv[:, :e].reshape(x1.shape)
    v = kv[:, e:].reshape(x1.shape)
    s = jnp.einsum("be,bte->bt", q, k)           # scale already folded into wq/bq
    p = jax.nn.softmax(s, axis=-1)
    ctx = jnp.einsum("bt,bte->be", p, v)
    att = jnp.dot(ctx.astype(bf), kp["wo"],
                  preferred_element_type=jnp.float32) + kp["bo"]
    dot = x0 * att
    return jnp.concatenate([x0, dot, att], axis=0).reshape(-1)


def _reference_f32(x0, x1, fp):
    """Pure-f32 semantic reference (bf16 matmul rounding is the only kernel delta)."""
    e = x0.shape[-1]
    q = x0 @ fp["wq"].T + fp["bq"]
    k = jnp.einsum("bte,fe->btf", x1, fp["wk"]) + fp["bk"]
    v = jnp.einsum("bte,fe->btf", x1, fp["wv"]) + fp["bv"]
    s = jnp.einsum("be,bte->bt", q, k) / jnp.sqrt(jnp.float32(e))
    p = jax.nn.softmax(s, axis=-1)
    ctx = jnp.einsum("bt,bte->be", p, v)
    att = ctx @ fp["wo"].T + fp["bo"]
    dot = x0 * att
    return jnp.concatenate([x0, dot, att], axis=0).reshape(-1)


if __name__ == "__main__":
    E = 128  # embedding_dim (multiple of 128 -> lane-dense stores)
    B = 16   # users (small -> TB=B, single grid step, no per-step overhead)
    T = 8    # items per user

    key = jax.random.PRNGKey(0)
    k_x0, k_x1, k_p = jax.random.split(key, 3)
    x0 = jax.random.normal(k_x0, (B, E), jnp.float32)
    x1 = jax.random.normal(k_x1, (B, T, E), jnp.float32)
    kparams, f32_params = init_params(k_p, E)

    out = jax.block_until_ready(drr_att_sr(x0, x1, kparams))
    assert out.shape == (3 * B * E,), out.shape

    # x0 passthrough slice of the fused concat must be exact.
    assert jnp.array_equal(out[:B * E], x0.reshape(-1)), "x0 passthrough mismatch"
    # Tight check vs a pure-JAX reference with matching bf16/f32-acc numerics.
    ref_bf = _reference_bf16(x0, x1, kparams)
    assert jnp.allclose(out, ref_bf, atol=1e-2, rtol=1e-2), "mismatch vs bf16 reference"
    # Loose check vs the full-f32 semantic reference.
    ref32 = _reference_f32(x0, x1, f32_params)
    assert jnp.allclose(out, ref32, atol=1e-1, rtol=1e-1), "mismatch vs f32 reference"

    print("KERNEL_OK")
</pallas_src>

<mosaic_0001>
module attributes {stable_mosaic.version = 11 : i64} {
  func.func @_drr_att_kernel(%arg0: i32, %arg1: memref<16x128xf32, #tpu.memory_space<vmem>>, %arg2: memref<128x128xf32, #tpu.memory_space<vmem>>, %arg3: memref<128x128xbf16, #tpu.memory_space<vmem>>, %arg4: memref<1x128xf32, #tpu.memory_space<vmem>>, %arg5: memref<128x256xbf16, #tpu.memory_space<vmem>>, %arg6: memref<1x256xf32, #tpu.memory_space<vmem>>, %arg7: memref<128x128xbf16, #tpu.memory_space<vmem>>, %arg8: memref<1x128xf32, #tpu.memory_space<vmem>>, %arg9: memref<3x16x128xf32, #tpu.memory_space<vmem>>) attributes {dimension_semantics = [#tpu.dimension_semantics<parallel>], iteration_bounds = array<i64: 1>, scalar_prefetch = 0 : i64, scratch_operands = 0 : i64, tpu.core_type = #tpu.core_type<tc>, window_params = [{transform_indices = @transform_0, window_bounds = array<i64: 16, 128>}, {transform_indices = @transform_1, window_bounds = array<i64: 128, 128>}, {pipeline_mode = #tpu.pipeline_mode<synchronous>, transform_indices = @transform_2, window_bounds = array<i64: 128, 128>}, {pipeline_mode = #tpu.pipeline_mode<synchronous>, transform_indices = @transform_3, window_bounds = array<i64: 1, 128>}, {pipeline_mode = #tpu.pipeline_mode<synchronous>, transform_indices = @transform_4, window_bounds = array<i64: 128, 256>}, {pipeline_mode = #tpu.pipeline_mode<synchronous>, transform_indices = @transform_5, window_bounds = array<i64: 1, 256>}, {pipeline_mode = #tpu.pipeline_mode<synchronous>, transform_indices = @transform_6, window_bounds = array<i64: 128, 128>}, {pipeline_mode = #tpu.pipeline_mode<synchronous>, transform_indices = @transform_7, window_bounds = array<i64: 1, 128>}, {transform_indices = @transform_8, window_bounds = array<i64: 3, 16, 128>}]} {
    %c0 = arith.constant 0 : index
    %c0_0 = arith.constant 0 : index
    %0 = vector.load %arg1[%c0, %c0_0] : memref<16x128xf32, #tpu.memory_space<vmem>>, vector<16x128xf32>
    %c0_1 = arith.constant 0 : index
    %c0_2 = arith.constant 0 : index
    %1 = vector.load %arg2[%c0_1, %c0_2] : memref<128x128xf32, #tpu.memory_space<vmem>>, vector<128x128xf32>
    %2 = arith.truncf %0 : vector<16x128xf32> to vector<16x128xbf16>
    %c0_3 = arith.constant 0 : index
    %c0_4 = arith.constant 0 : index
    %3 = vector.load %arg3[%c0_3, %c0_4] : memref<128x128xbf16, #tpu.memory_space<vmem>>, vector<128x128xbf16>
    %cst = arith.constant dense<0.000000e+00> : vector<16x128xf32>
    %4 = tpu.matmul %2, %3, %cst {dimension_numbers = #tpu.dot_dimension_numbers<[1], [0], [0], [1], [0, 0, 1, 1], [], []>} : vector<16x128xbf16>, vector<128x128xbf16>, vector<16x128xf32> -> vector<16x128xf32>
    %c0_5 = arith.constant 0 : index
    %c0_6 = arith.constant 0 : index
    %5 = vector.load %arg4[%c0_5, %c0_6] : memref<1x128xf32, #tpu.memory_space<vmem>>, vector<1x128xf32>
    %6 = vector.broadcast %5 : vector<1x128xf32> to vector<16x128xf32>
    %7 = arith.addf %4, %6 : vector<16x128xf32>
    %8 = arith.truncf %1 : vector<128x128xf32> to vector<128x128xbf16>
    %c0_7 = arith.constant 0 : index
    %c0_8 = arith.constant 0 : index
    %9 = vector.load %arg5[%c0_7, %c0_8] : memref<128x256xbf16, #tpu.memory_space<vmem>>, vector<128x256xbf16>
    %cst_9 = arith.constant dense<0.000000e+00> : vector<128x256xf32>
    %10 = tpu.matmul %8, %9, %cst_9 {dimension_numbers = #tpu.dot_dimension_numbers<[1], [0], [0], [1], [0, 0, 1, 1], [], []>} : vector<128x128xbf16>, vector<128x256xbf16>, vector<128x256xf32> -> vector<128x256xf32>
    %c0_10 = arith.constant 0 : index
    %c0_11 = arith.constant 0 : index
    %11 = vector.load %arg6[%c0_10, %c0_11] : memref<1x256xf32, #tpu.memory_space<vmem>>, vector<1x256xf32>
    %12 = vector.broadcast %11 : vector<1x256xf32> to vector<128x256xf32>
    %13 = arith.addf %10, %12 : vector<128x256xf32>
    %14 = vector.extract_strided_slice %13 {offsets = [0, 0], sizes = [128, 128], strides = [1, 1]} : vector<128x256xf32> to vector<128x128xf32>
    %15 = vector.shape_cast %14 : vector<128x128xf32> to vector<16x8x128xf32>
    %16 = vector.extract_strided_slice %13 {offsets = [0, 128], sizes = [128, 128], strides = [1, 1]} : vector<128x256xf32> to vector<128x128xf32>
    %17 = vector.shape_cast %16 : vector<128x128xf32> to vector<16x8x128xf32>
    %18 = vector.shape_cast %7 : vector<16x128xf32> to vector<16x1x128xf32>
    %19 = vector.broadcast %18 : vector<16x1x128xf32> to vector<16x8x128xf32>
    %20 = arith.mulf %19, %15 : vector<16x8x128xf32>
    %cst_12 = arith.constant dense<0.000000e+00> : vector<16x8xf32>
    %21 = vector.multi_reduction <add>, %20, %cst_12 [2] : vector<16x8x128xf32> to vector<16x8xf32>
    %cst_13 = arith.constant dense<0xFF800000> : vector<16xf32>
    %22 = vector.multi_reduction <maximumf>, %21, %cst_13 [1] : vector<16x8xf32> to vector<16xf32>
    %23 = vector.shape_cast %22 : vector<16xf32> to vector<16x1xf32>
    %24 = vector.broadcast %23 : vector<16x1xf32> to vector<16x8xf32>
    %25 = arith.subf %21, %24 : vector<16x8xf32>
    %26 = math.exp %25 : vector<16x8xf32>
    %cst_14 = arith.constant dense<0.000000e+00> : vector<16xf32>
    %27 = vector.multi_reduction <add>, %26, %cst_14 [1] : vector<16x8xf32> to vector<16xf32>
    %28 = vector.shape_cast %27 : vector<16xf32> to vector<16x1xf32>
    %29 = tpu.reciprocal %28 {approx = true} : vector<16x1xf32> -> vector<16x1xf32>
    %30 = vector.broadcast %29 : vector<16x1xf32> to vector<16x8xf32>
    %31 = arith.mulf %26, %30 : vector<16x8xf32>
    %32 = vector.shape_cast %31 : vector<16x8xf32> to vector<16x8x1xf32>
    %33 = vector.broadcast %32 : vector<16x8x1xf32> to vector<16x8x128xf32>
    %34 = arith.mulf %33, %17 : vector<16x8x128xf32>
    %cst_15 = arith.constant dense<0.000000e+00> : vector<16x128xf32>
    %35 = vector.multi_reduction <add>, %34, %cst_15 [1] : vector<16x8x128xf32> to vector<16x128xf32>
    %36 = arith.truncf %35 : vector<16x128xf32> to vector<16x128xbf16>
    %c0_16 = arith.constant 0 : index
    %c0_17 = arith.constant 0 : index
    %37 = vector.load %arg7[%c0_16, %c0_17] : memref<128x128xbf16, #tpu.memory_space<vmem>>, vector<128x128xbf16>
    %cst_18 = arith.constant dense<0.000000e+00> : vector<16x128xf32>
    %38 = tpu.matmul %36, %37, %cst_18 {dimension_numbers = #tpu.dot_dimension_numbers<[1], [0], [0], [1], [0, 0, 1, 1], [], []>} : vector<16x128xbf16>, vector<128x128xbf16>, vector<16x128xf32> -> vector<16x128xf32>
    %c0_19 = arith.constant 0 : index
    %c0_20 = arith.constant 0 : index
    %39 = vector.load %arg8[%c0_19, %c0_20] : memref<1x128xf32, #tpu.memory_space<vmem>>, vector<1x128xf32>
    %40 = vector.broadcast %39 : vector<1x128xf32> to vector<16x128xf32>
    %41 = arith.addf %38, %40 : vector<16x128xf32>
    %c0_21 = arith.constant 0 : index
    %c0_22 = arith.constant 0 : index
    %c0_23 = arith.constant 0 : index
    %42 = vector.load %arg9[%c0_21, %c0_22, %c0_23] : memref<3x16x128xf32, #tpu.memory_space<vmem>>, vector<1x16x128xf32>
    %43 = vector.shape_cast %42 : vector<1x16x128xf32> to vector<16x128xf32>
    %44 = vector.shape_cast %0 : vector<16x128xf32> to vector<1x16x128xf32>
    tpu.vector_store %arg9[%c0_21, %c0_22, %c0_23], %44 {strides = array<i32>} : memref<3x16x128xf32, #tpu.memory_space<vmem>>, vector<1x16x128xf32>,
    %45 = arith.mulf %0, %41 : vector<16x128xf32>
    %c1 = arith.constant 1 : index
    %c0_24 = arith.constant 0 : index
    %c0_25 = arith.constant 0 : index
    %46 = vector.load %arg9[%c1, %c0_24, %c0_25] : memref<3x16x128xf32, #tpu.memory_space<vmem>>, vector<1x16x128xf32>
    %47 = vector.shape_cast %46 : vector<1x16x128xf32> to vector<16x128xf32>
    %48 = vector.shape_cast %45 : vector<16x128xf32> to vector<1x16x128xf32>
    tpu.vector_store %arg9[%c1, %c0_24, %c0_25], %48 {strides = array<i32>} : memref<3x16x128xf32, #tpu.memory_space<vmem>>, vector<1x16x128xf32>,
    %c2 = arith.constant 2 : index
    %c0_26 = arith.constant 0 : index
    %c0_27 = arith.constant 0 : index
    %49 = vector.load %arg9[%c2, %c0_26, %c0_27] : memref<3x16x128xf32, #tpu.memory_space<vmem>>, vector<1x16x128xf32>
    %50 = vector.shape_cast %49 : vector<1x16x128xf32> to vector<16x128xf32>
    %51 = vector.shape_cast %41 : vector<16x128xf32> to vector<1x16x128xf32>
    tpu.vector_store %arg9[%c2, %c0_26, %c0_27], %51 {strides = array<i32>} : memref<3x16x128xf32, #tpu.memory_space<vmem>>, vector<1x16x128xf32>,
    return
  }
  func.func @transform_0(%arg0: i32) -> (i32, i32) {
    %c0_i32 = arith.constant 0 : i32
    %c0_i32_0 = arith.constant 0 : i32
    return %arg0, %c0_i32 : i32, i32
  }
  func.func @transform_1(%arg0: i32) -> (i32, i32) {
    %c0_i32 = arith.constant 0 : i32
    %c0_i32_0 = arith.constant 0 : i32
    return %arg0, %c0_i32 : i32, i32
  }
  func.func @transform_2(%arg0: i32) -> (i32, i32) {
    %c0_i32 = arith.constant 0 : i32
    %c0_i32_0 = arith.constant 0 : i32
    %c0_i32_1 = arith.constant 0 : i32
    return %c0_i32, %c0_i32_0 : i32, i32
  }
  func.func @transform_3(%arg0: i32) -> (i32, i32) {
    %c0_i32 = arith.constant 0 : i32
    %c0_i32_0 = arith.constant 0 : i32
    %c0_i32_1 = arith.constant 0 : i32
    return %c0_i32, %c0_i32_0 : i32, i32
  }
  func.func @transform_4(%arg0: i32) -> (i32, i32) {
    %c0_i32 = arith.constant 0 : i32
    %c0_i32_0 = arith.constant 0 : i32
    %c0_i32_1 = arith.constant 0 : i32
    return %c0_i32, %c0_i32_0 : i32, i32
  }
  func.func @transform_5(%arg0: i32) -> (i32, i32) {
    %c0_i32 = arith.constant 0 : i32
    %c0_i32_0 = arith.constant 0 : i32
    %c0_i32_1 = arith.constant 0 : i32
    return %c0_i32, %c0_i32_0 : i32, i32
  }
  func.func @transform_6(%arg0: i32) -> (i32, i32) {
    %c0_i32 = arith.constant 0 : i32
    %c0_i32_0 = arith.constant 0 : i32
    %c0_i32_1 = arith.constant 0 : i32
    return %c0_i32, %c0_i32_0 : i32, i32
  }
  func.func @transform_7(%arg0: i32) -> (i32, i32) {
    %c0_i32 = arith.constant 0 : i32
    %c0_i32_0 = arith.constant 0 : i32
    %c0_i32_1 = arith.constant 0 : i32
    return %c0_i32, %c0_i32_0 : i32, i32
  }
  func.func @transform_8(%arg0: i32) -> (i32, i32, i32) {
    %c0_i32 = arith.constant 0 : i32
    %c0_i32_0 = arith.constant 0 : i32
    %c0_i32_1 = arith.constant 0 : i32
    return %c0_i32, %arg0, %c0_i32_0 : i32, i32, i32
  }
}

</mosaic_0001>

<bundles_post_ra>
// kernel: tpu_custom_call.1
= control target key start
LH: loop header
LB: loop body
LE: loop exit
PB: predicated region body
PF: predicated region fallthrough
CT: control target
= control target key end

     0   :  { %13 = vsyncpa [#allocation3], 0  ;;  %s2419_s0 = inlined_call_operand.hbm [shape: f32[16,128], index: 0, kind: input, shape index: {}]   ;;  %s2420_s1 = inlined_call_operand.hbm [shape: f32[128,128], index: 1, kind: input, shape index: {}]   ;;  %s2421_s2 = inlined_call_operand.hbm [shape: bf16[128,128], index: 2, kind: input, shape index: {}]   ;;  %s2422_s3 = inlined_call_operand.vmem [shape: f32[1,128], index: 3, kind: input, shape index: {}]   ;;  %s2423_s4 = inlined_call_operand.hbm [shape: bf16[128,256], index: 4, kind: input, shape index: {}]   ;;  %s2424_s5 = inlined_call_operand.vmem [shape: f32[1,256], index: 5, kind: input, shape index: {}]   ;;  %s2425_s6 = inlined_call_operand.hbm [shape: bf16[128,128], index: 6, kind: input, shape index: {}]   ;;  %s2426_s7 = inlined_call_operand.vmem [shape: f32[1,128], index: 7, kind: input, shape index: {}]   ;;  %s2427_s8 = inlined_call_operand.hbm [shape: f32[3,16,128], index: 8, kind: output, shape index: {}]  }
   0x1   :  { %14 = vsyncpa [#allocation6], 0 }
   0x2   :  { %15 = vsyncpa [#allocation9], 0 }
   0x3   :  { %16 = vsyncpa [#allocation4], 0  ;;  %s1890_s27 = smov [#allocation5]   ;;  %s1891_s29 = smov [#allocation8]  }
   0x4   :  { %s34_s28 = sshll.u32 %s1890_s27, 4  ;;  %s60_s30 = sshll.u32 %s1891_s29, 4  ;;  %s35_s28 = int_to_ptr.vmem [resolvable:$true] %s34_s28  ;;  %s61_s30 = int_to_ptr.vmem [resolvable:$true] %s60_s30 }
   0x5   :  { %s1770_s9 = scalar_lea.vmem %s35_s28, 2048  ;;  %p1775_p1 = scmp.lt.s32.totalorder %s35_s28, %s35_s28 }
   0x6   :  { %p1771_p0 = scmp.ne.s32.totalorder %s35_s28, %s1770_s9  ;;  %p1776_p2 = scmp.lt.s32.totalorder %s1770_s9, %s1770_s9 }
   0x8   :  { %p1777_p3 = por %p1776_p2, %p1775_p1 }
   0xa   :  { %p1778_p4 = pnand %p1777_p3, %p1771_p0 }
   0xc   :  { %1781 = shalt.err (!%p1778_p4)
}
   0xd   :  { %s1892_s10 = smov 128   ;;  %s1893_s11 = smov 8  }
   0xe   :  { %40 = dma.hbm_to_vmem [thread:$0]  %s2420_s1, 2048, %s35_s28, [#allocation6], %s1892_s10, %s1892_s10, %s1893_s11  }
   0xf   :  { %s1790_s14 = scalar_lea.vmem %s61_s30, 2048  ;;  %p1795_p6 = scmp.lt.s32.totalorder %s61_s30, %s61_s30 }
  0x10   :  { %p1791_p5 = scmp.ne.s32.totalorder %s61_s30, %s1790_s14  ;;  %p1796_p7 = scmp.lt.s32.totalorder %s1790_s14, %s1790_s14 }
  0x12   :  { %p1797_p8 = por %p1796_p7, %p1795_p6 }
  0x14   :  { %p1798_p9 = pnand %p1797_p8, %p1791_p5 }
  0x16   :  { %1801 = shalt.err (!%p1798_p9)
}
  0x17   :  { %66 = dma.hbm_to_vmem [thread:$0]  %s2423_s4, 2048, %s61_s30, [#allocation9], %s1892_s10, %s1892_s10, %s1893_s11  }
  0x18   :  { %s1894_s17 = smov [#allocation2]   ;;  %s1895_s19 = smov [#allocation7]  }
  0x19   :  { %s22_s18 = sshll.u32 %s1894_s17, 4  ;;  %s46_s20 = sshll.u32 %s1895_s19, 4  ;;  %s23_s18 = int_to_ptr.vmem [resolvable:$true] %s22_s18  ;;  %s47_s20 = int_to_ptr.vmem [resolvable:$true] %s46_s20 }
  0x1a   :  { %s1810_s1 = scalar_lea.vmem %s23_s18, 256  ;;  %p1815_p11 = scmp.lt.s32.totalorder %s23_s18, %s23_s18 }
  0x1b   :  { %p1811_p10 = scmp.ne.s32.totalorder %s23_s18, %s1810_s1  ;;  %p1816_p12 = scmp.lt.s32.totalorder %s1810_s1, %s1810_s1 }
  0x1d   :  { %p1817_p13 = por %p1816_p12, %p1815_p11 }
  0x1f   :  { %p1818_p0 = pnand %p1817_p13, %p1811_p10 }
  0x21   :  { %1821 = shalt.err (!%p1818_p0)
}
  0x22   :  { %28 = dma.hbm_to_vmem [thread:$0]  %s2419_s0, 256, %s23_s18, [#allocation3], %s1892_s10, %s1892_s10, %s1893_s11  }
  0x23   :  { %s1830_s4 = scalar_lea.vmem %s47_s20, 1024  ;;  %p1835_p2 = scmp.lt.s32.totalorder %s47_s20, %s47_s20 }
  0x24   :  { %p1831_p1 = scmp.ne.s32.totalorder %s47_s20, %s1830_s4  ;;  %p1836_p3 = scmp.lt.s32.totalorder %s1830_s4, %s1830_s4 }
  0x26   :  { %p1837_p4 = por %p1836_p3, %p1835_p2 }
  0x28   :  { %p1838_p5 = pnand %p1837_p4, %p1831_p1 }
  0x2a   :  { %1841 = shalt.err (!%p1838_p5)
}
  0x2b   :  { %s1896_s23 = smov 64   ;;  %s1897_s24 = smov 4  }
  0x2c   :  { %52 = dma.hbm_to_vmem [thread:$0]  %s2421_s2, 1024, %s47_s20, [#allocation6], %s1896_s23, %s1896_s23, %s1897_s24  }
  0x2d   :  { %s1898_s27 = smov [#allocation10]  }
  0x2e   :  { %s74_s28 = sshll.u32 %s1898_s27, 4  ;;  %s75_s28 = int_to_ptr.vmem [resolvable:$true] %s74_s28 }
  0x2f   :  { %s1850_s29 = scalar_lea.vmem %s75_s28, 1024  ;;  %p1855_p7 = scmp.lt.s32.totalorder %s75_s28, %s75_s28 }
  0x30   :  { %p1851_p6 = scmp.ne.s32.totalorder %s75_s28, %s1850_s29  ;;  %p1856_p8 = scmp.lt.s32.totalorder %s1850_s29, %s1850_s29 }
  0x32   :  { %p1857_p9 = por %p1856_p8, %p1855_p7 }
  0x34   :  { %p1858_p10 = pnand %p1857_p9, %p1851_p6 }
  0x36   :  { %1861 = shalt.err (!%p1858_p10)
}
  0x37   :  { %80 = dma.hbm_to_vmem [thread:$0]  %s2425_s6, 1024, %s75_s28, [#allocation9], %s1896_s23, %s1896_s23, %s1897_s24  }
  0x38   :  { %1882 = dma.done.wait [#allocation3], 256  }
  0x39   :  { %1883 = vsyncadd [#allocation3], 4294967040 }
  0x3a   :  { %1884 = dma.done.wait [#allocation6], 3072  }
  0x3b   :  { %1885 = vsyncadd [#allocation6], 4294964224 }
  0x3c   :  { %1886 = dma.done.wait [#allocation9], 3072  }
  0x3d   :  { %1887 = vsyncadd [#allocation9], 4294964224  ;;  %v2428_v0 = vmov 0.0   ;;  %vm1900_vm0 = vmmov 0   ;;  %v1901_v1 = vmov 0   ;;  %v1684_v2 = vld [vmem:[#allocation7 + $0x38] sm:$0xff]   ;;  %v256_v53 = vlaneseq }
  0x3e   :  { %1628 = vmatprep.subr.bf16.mxu0 %v2428_v0  ;;  %1644 = vmatprep.mubr.msk.bf16.mxu0 %vm1900_vm0, %v2428_v0  ;;  %v1685_v3 = vld [vmem:[#allocation8 + $0x74] ss:$8 sps:$4 sm:$0xff]   ;;  %v1687_v4 = vld [vmem:[#allocation8 + $0x70] ss:$8 sps:$4 sm:$0xff]   ;;  %v1689_v6 = vld [vmem:[#allocation8 + $0x64] ss:$8 sps:$4 sm:$0xff]  }
  0x3f   :  { %378 = vmatprep.mubr.bf16.mxu1 %v1901_v1  ;;  %1683 = vset.pattern.permute.xlu1 %v1901_v1  ;;  %v1688_v5 = vld [vmem:[#allocation7 + $0x30] sm:$0xff]   ;;  %v1691_v7 = vld [vmem:[#allocation8 + $0x60] ss:$8 sps:$4 sm:$0xff]   ;;  %v1697_v11 = vld [vmem:[#allocation8 + $0x44] ss:$8 sps:$4 sm:$0xff]   ;;  %v1997_v56 = vshrl.u32 %v256_v53, 7 }
  0x40   :  { %1682 = vset.pattern.permute.xlu0 %v1901_v1  ;;  %1629 = vmatpush3.bf16.msra.mxu0 %v1684_v2  ;;  %v1692_v8 = vld [vmem:[#allocation7 + $0x28] sm:$0xff]   ;;  %v1693_v9 = vld [vmem:[#allocation8 + $0x54] ss:$8 sps:$4 sm:$0xff]   ;;  %v1695_v10 = vld [vmem:[#allocation8 + $0x50] ss:$8 sps:$4 sm:$0xff]   ;;  %vm769_vm1 = vcmask 1041409  }
  0x41   :  { %346 = vmatprep.subr.bf16.mxu1 %v1685_v3  ;;  %1630 = vmatprep.subr.bf16.mxu0 %v2428_v0  ;;  %v1696_v12 = vld [vmem:[#allocation7 + $0x20] sm:$0xff]   ;;  %v1701_v14 = vld [vmem:[#allocation8 + $0x34] ss:$8 sps:$4 sm:$0xff]   ;;  %v1703_v16 = vld [vmem:[#allocation8 + $0x30] ss:$8 sps:$4 sm:$0xff]   ;;  %v2000_v58 = vsub.s32 1, %v1997_v56 }
  0x42   :  { %347 = vmatpush1.bf16.msra.mxu1 %v1687_v4  ;;  %v1699_v13 = vld [vmem:[#allocation8 + $0x40] ss:$8 sps:$4 sm:$0xff]   ;;  %v1700_v15 = vld [vmem:[#allocation7 + $0x18] sm:$0xff]   ;;  %v1705_v17 = vld [vmem:[#allocation8 + $0x24] ss:$8 sps:$4 sm:$0xff]   ;;  %v2009_v62 = vsub.s32 0, %v1997_v56 }
  0x43   :  { %348 = vmatprep.subr.bf16.mxu1 %v1689_v6  ;;  %v1704_v18 = vld [vmem:[#allocation7 + $0x10] sm:$0xff]   ;;  %v100_v20 = vld [vmem:[#allocation2 + $0x8] sm:$0xff]  ;;  %v1707_v21 = vld [vmem:[#allocation8 + $0x20] ss:$8 sps:$4 sm:$0xff]   ;;  %v1902_v54 = vmov 1966171168  }
  0x44   :  { %1631 = vmatpush3.bf16.msra.mxu0 %v1688_v5  ;;  %v99_v19 = vld [vmem:[#allocation2] sm:$0xff]  ;;  %1548 = vst [vmem:[#allocation11 + $0x8] sm:$0xff] %v100_v20  ;;  %v1708_v23 = vld [vmem:[#allocation7 + $0x8] sm:$0xff]   ;;  %v1712_v25 = vld [vmem:[#allocation7] sm:$0xff]   ;;  %v463_v55 = vunpack.c.l.s4 %v1902_v54  ;;  %vm771_vm2 = vcmask 1042434   ;;  %vm773_vm3 = vcmask 1043459  }
  0x45   :  { %1632 = vmatprep.subr.bf16.mxu0 %v2428_v0  ;;  %1547 = vst [vmem:[#allocation11] sm:$0xff] %v99_v19  ;;  %v1709_v22 = vld [vmem:[#allocation8 + $0x14] ss:$8 sps:$4 sm:$0xff]   ;;  %v1711_v24 = vld [vmem:[#allocation8 + $0x10] ss:$8 sps:$4 sm:$0xff]   ;;  %v101_v28 = vld [vmem:[#allocation5] sm:$0xff]  ;;  %v117_v30 = vpack.c.bf16 %v100_v20, %v99_v19 }
  0x46   :  { %349 = vmatpush1.bf16.msra.mxu1 %v1691_v7  ;;  %v1713_v26 = vld [vmem:[#allocation8 + $0x4] ss:$8 sps:$4 sm:$0xff]   ;;  %v1715_v27 = vld [vmem:[#allocation8] ss:$8 sps:$4 sm:$0xff]   ;;  %v103_v32 = vld [vmem:[#allocation5 + $0x10] sm:$0xff]  ;;  %v464_v57 = vunpack.c.0.s8 %v463_v55  ;;  %vm775_vm4 = vcmask 1044484  }
  0x47   :  { %350 = vmatprep.subr.bf16.mxu1 %v1693_v9  ;;  %v102_v29 = vld [vmem:[#allocation5 + $0x8] sm:$0xff]  ;;  %v104_v33 = vld [vmem:[#allocation5 + $0x18] sm:$0xff]  ;;  %v105_v35 = vld [vmem:[#allocation5 + $0x20] sm:$0xff]  ;;  %vm777_vm5 = vcmask 1045509   ;;  %vm779_vm6 = vcmask 1046534   ;;  %vm781_vm7 = vcmask 1047559  }
  0x48   :  { %1633 = vmatpush3.bf16.msra.mxu0 %v1692_v8  ;;  %v230_v31 = vpack.c.bf16 %v102_v29, %v101_v28  ;;  %v231_v34 = vpack.c.bf16 %v104_v33, %v103_v32  ;;  %v106_v36 = vld [vmem:[#allocation5 + $0x28] sm:$0xff]  ;;  %v107_v38 = vld [vmem:[#allocation5 + $0x30] sm:$0xff]  ;;  %v108_v39 = vld [vmem:[#allocation5 + $0x38] sm:$0xff]  ;;  %v2006_v60 = vsub.s32 %v464_v57, %v1997_v56  ;;  %vm792_vm8 = vcmask 64512   ;;  %s1903_s13 = smov [#allocation11]  }
  0x49   :  { %1634 = vmatprep.subr.bf16.mxu0 %v2428_v0  ;;  %v232_v37 = vpack.c.bf16 %v106_v36, %v105_v35  ;;  %v233_v40 = vpack.c.bf16 %v108_v39, %v107_v38  ;;  %v109_v41 = vld [vmem:[#allocation5 + $0x40] sm:$0xff]  ;;  %v110_v42 = vld [vmem:[#allocation5 + $0x48] sm:$0xff]  ;;  %v111_v44 = vld [vmem:[#allocation5 + $0x50] sm:$0xff]  ;;  %s1562_s14 = sshll.u32 %s1903_s13, 4  ;;  %s1563_s14 = int_to_ptr.vmem [resolvable:$true] %s1562_s14 }
  0x4a   :  { %351 = vmatpush1.bf16.msra.mxu1 %v1695_v10  ;;  %v234_v43 = vpack.c.bf16 %v110_v42, %v109_v41  ;;  %v112_v45 = vld [vmem:[#allocation5 + $0x58] sm:$0xff]  ;;  %v113_v47 = vld [vmem:[#allocation5 + $0x60] sm:$0xff]  ;;  %v114_v48 = vld [vmem:[#allocation5 + $0x68] sm:$0xff]  ;;  %s1862_s15 = scalar_lea.vmem %s1563_s14, 768  ;;  %p1867_p12 = scmp.lt.s32.totalorder %s1563_s14, %s1563_s14 }
  0x4b   :  { %352 = vmatprep.subr.bf16.mxu1 %v1697_v11  ;;  %v235_v46 = vpack.c.bf16 %v112_v45, %v111_v44  ;;  %v236_v49 = vpack.c.bf16 %v114_v48, %v113_v47  ;;  %v115_v50 = vld [vmem:[#allocation5 + $0x70] sm:$0xff]  ;;  %v116_v51 = vld [vmem:[#allocation5 + $0x78] sm:$0xff]  ;;  %p1863_p11 = scmp.ne.s32.totalorder %s1563_s14, %s1862_s15  ;;  %p1868_p13 = scmp.lt.s32.totalorder %s1862_s15, %s1862_s15 }
  0x4c   :  { %1635 = vmatpush3.bf16.msra.mxu0 %v1696_v12  ;;  %v237_v52 = vpack.c.bf16 %v116_v51, %v115_v50  ;;  %v1576_v59 = vld [vmem:[%s2422_s3] ss:$0 sm:$0xff] }
  0x4d   :  { %1636 = vmatprep.subr.bf16.mxu0 %v2428_v0  ;;  %v254_v63 = vld [vmem:[%s2424_s5] sm:$0x3]  ;;  %p1869_p0 = por %p1868_p13, %p1867_p12 }
  0x4e   :  { %353 = vmatpush1.bf16.msra.mxu1 %v1699_v13  ;;  %v2015_v2 = vrot.slane %v254_v63, %v2000_v58  ;;  %v2019_v6 = vrot.slane %v254_v63, %v2009_v62 }
  0x4f   :  { %354 = vmatprep.subr.bf16.mxu1 %v1701_v14  ;;  %p1870_p1 = pnand %p1869_p0, %p1863_p11 }
  0x50   :  { %1637 = vmatpush3.bf16.msra.mxu0 %v1700_v15 }
  0x51   :  { %1638 = vmatprep.subr.bf16.mxu0 %v2428_v0 }
  0x52   :  { %355 = vmatpush1.bf16.msra.mxu1 %v1703_v16 }
  0x53   :  { %356 = vmatprep.subr.bf16.mxu1 %v1705_v17 }
  0x54   :  { %1639 = vmatpush3.bf16.msra.mxu0 %v1704_v18 }
  0x55   :  { %1640 = vmatprep.subr.bf16.mxu0 %v2428_v0 }
  0x56   :  { %357 = vmatpush1.bf16.msra.mxu1 %v1707_v21 }
  0x57   :  { %358 = vmatprep.subr.bf16.mxu1 %v1709_v22 }
  0x58   :  { %1641 = vmatpush3.bf16.msra.mxu0 %v1708_v23 }
  0x59   :  { %1642 = vmatprep.subr.bf16.mxu0 %v2428_v0 }
  0x5a   :  { %359 = vmatpush1.bf16.msra.mxu1 %v1711_v24 }
  0x5b   :  { %360 = vmatprep.subr.bf16.mxu1 %v1713_v26 }
  0x5c   :  { %1643 = vmatpush3.bf16.msra.mxu0 %v1712_v25 }
  0x5d   :  { %1648 = vmatprep.subr.bf16.mxu0 %v2428_v0 }
  0x5e   :  { %361 = vmatpush1.bf16.msra.mxu1 %v1715_v27 }
  0x5f   :  { %1645 = vmatmul.mubr.bf16.vlgmr.msra.gmra.mxu0 %v117_v30 }
  0x60   :  { %1664 = vmatprep.mubr.msk.bf16.mxu0 %vm1900_vm0, %v2428_v0 }
  0x61   :  { %379 = vmatmul.mubr.bf16.vlgmr.msra.gmra.mxu1 %v230_v31 }
  0x62   :  { %388 = vmatprep.mubr.bf16.mxu1 %v1901_v1 }
  0x69   :  { %389 = vmatmul.mubr.bf16.gmra.mxu1 %v231_v34 }
  0x6a   :  { %398 = vmatprep.mubr.bf16.mxu1 %v1901_v1 }
  0x71   :  { %399 = vmatmul.mubr.bf16.gmra.mxu1 %v232_v37 }
  0x72   :  { %408 = vmatprep.mubr.bf16.mxu1 %v1901_v1 }
  0x79   :  { %409 = vmatmul.mubr.bf16.gmra.mxu1 %v233_v40 }
  0x7a   :  { %418 = vmatprep.mubr.bf16.mxu1 %v1901_v1 }
  0x81   :  { %419 = vmatmul.mubr.bf16.gmra.mxu1 %v234_v43 }
  0x82   :  { %428 = vmatprep.mubr.bf16.mxu1 %v1901_v1 }
  0x89   :  { %429 = vmatmul.mubr.bf16.gmra.mxu1 %v235_v46 }
  0x8a   :  { %438 = vmatprep.mubr.bf16.mxu1 %v1901_v1 }
  0x91   :  { %439 = vmatmul.mubr.bf16.gmra.mxu1 %v236_v49 }
  0x92   :  { %448 = vmatprep.mubr.bf16.mxu1 %v1901_v1 }
  0x99   :  { %449 = vmatmul.mubr.bf16.gmra.mxu1 %v237_v52 }
 0x11f   :  { %v223_v61 = vpop.f32.mrf.mxu0 }
 0x120   :  { %v224_v1 = vadd.f32 %v1576_v59, %v223_v61 }
 0x121   :  { %v380_v3 = vpop.f32.mrf.mxu1  ;;  %v1646_v4 = vpop.f32.mrf.mxu0 }
 0x122   :  { %v468_v5 = vrot.slane %v224_v1, %v2006_v60  ;;  %v381_v14 = vadd.f32 %v380_v3, %v2019_v6  ;;  %v461_v23 = vcombine.high %v224_v1, %v224_v1 }
 0x123   :  { %v382_v7 = vpop.f32.mrf.mxu1  ;;  %v226_v8 = vpop.f32.mrf.mxu0 }
 0x124   :  { %v476_v9 = vcombine.high %v468_v5, %v468_v5  ;;  %v2022_v10 = vadd.f32 %v382_v7, %v2015_v2  ;;  %v484_v13 = vrot.slane %v468_v5, %v2006_v60  ;;  %v475_v32 = vrot.slane %v461_v23, %v2006_v60 }
 0x125   :  { %v384_v11 = vpop.f32.mrf.mxu1  ;;  %v1647_v12 = vpop.f32.mrf.mxu0  ;;  %v227_v46 = vadd.f32 %v1576_v59, %v226_v8 }
 0x126   :  { %v562_v16 = vrot.slane %v484_v13, %v2009_v62  ;;  %v498_v17 = vrot.slane %v476_v9, %v2006_v60  ;;  %v506_v22 = vcombine.high %v484_v13, %v484_v13  ;;  %v385_v24 = vadd.f32 %v384_v11, %v2019_v6 }
 0x127   :  { %v386_v15 = vpop.f32.mrf.mxu1  ;;  %v477_v39 = vcombine.high %v475_v32, %v475_v32  ;;  %v491_v41 = vrot.slane %v475_v32, %v2006_v60  ;;  %v517_v55 = vrot.slane %v227_v46, %v2006_v60 }
 0x128   :  { %v2029_v18 = vadd.f32 %v386_v15, %v2015_v2  ;;  %v639_v20 = vmul.f32 %v562_v16, %v381_v14  ;;  %v566_v21 = vrot.slane %v498_v17, %v2009_v62  ;;  %v570_v30 = vrot.slane %v506_v22, %v2009_v62 }
 0x129   :  { %v390_v19 = vpop.f32.mrf.mxu1  ;;  %v508_v31 = vcombine.high %v498_v17, %v498_v17  ;;  %v578_v48 = vrot.slane %v491_v41, %v2009_v62  ;;  %v505_v49 = vrot.slane %v477_v39, %v2006_v60  ;;  %v507_v59 = vcombine.high %v491_v41, %v491_v41 }
 0x12a   :  { %655 = vadd.xlane.f32.xlu0 %v639_v20  ;;  %v391_v27 = vadd.f32 %v390_v19, %v2019_v6  ;;  %v640_v29 = vmul.f32 %v566_v21, %v385_v24  ;;  %v525_v5 = vcombine.high %v517_v55, %v517_v55  ;;  %v533_v7 = vrot.slane %v517_v55, %v2006_v60 }
 0x12b   :  { %v392_v25 = vpop.f32.mrf.mxu1  ;;  %v574_v38 = vrot.slane %v508_v31, %v2009_v62  ;;  %v582_v61 = vrot.slane %v505_v49, %v2009_v62  ;;  %v586_v9 = vrot.slane %v507_v59, %v2009_v62  ;;  %v509_v11 = vcombine.high %v505_v49, %v505_v49 }
 0x12c   :  { %v2034_v26 = vadd.f32 %v392_v25, %v2015_v2  ;;  %v641_v37 = vmul.f32 %v570_v30, %v391_v27  ;;  %v594_v17 = vrot.slane %v533_v7, %v2009_v62  ;;  %v547_v19 = vrot.slane %v525_v5, %v2006_v60 }
 0x12d   :  { %v394_v28 = vpop.f32.mrf.mxu1  ;;  %v590_v21 = vrot.slane %v509_v11, %v2009_v62  ;;  %v510_v27 = vcombine.high %v227_v46, %v227_v46  ;;  %v555_v30 = vcombine.high %v533_v7, %v533_v7 }
 0x12e   :  { %657 = vadd.xlane.f32.xlu0 %v640_v29  ;;  %v395_v35 = vadd.f32 %v394_v28, %v2019_v6  ;;  %v598_v29 = vrot.slane %v547_v19, %v2009_v62  ;;  %v557_v39 = vcombine.high %v547_v19, %v547_v19 }
 0x12f   :  { %v396_v33 = vpop.f32.mrf.mxu1 }
 0x130   :  { %v2040_v34 = vadd.f32 %v396_v33, %v2015_v2  ;;  %v642_v45 = vmul.f32 %v574_v38, %v395_v35  ;;  %v602_v38 = vrot.slane %v555_v30, %v2009_v62 }
 0x131   :  { %v400_v36 = vpop.f32.mrf.mxu1 }
 0x132   :  { %659 = vadd.xlane.f32.xlu0 %v641_v37  ;;  %v401_v43 = vadd.f32 %v400_v36, %v2019_v6  ;;  %v524_v36 = vrot.slane %v510_v27, %v2006_v60 }
 0x133   :  { %v402_v40 = vpop.f32.mrf.mxu1 }
 0x134   :  { %v2046_v42 = vadd.f32 %v402_v40, %v2015_v2  ;;  %v643_v54 = vmul.f32 %v578_v48, %v401_v43  ;;  %v540_v48 = vrot.slane %v524_v36, %v2006_v60 }
 0x135   :  { %v404_v44 = vpop.f32.mrf.mxu1 }
 0x136   :  { %661 = vadd.xlane.f32.xlu0 %v642_v45  ;;  %v405_v51 = vadd.f32 %v404_v44, %v2019_v6  ;;  %v526_v45 = vcombine.high %v524_v36, %v524_v36 }
 0x137   :  { %v406_v47 = vpop.f32.mrf.mxu1 }
 0x138   :  { %v2052_v50 = vadd.f32 %v406_v47, %v2015_v2  ;;  %v644_v4 = vmul.f32 %v582_v61, %v405_v51  ;;  %v606_v47 = vrot.slane %v557_v39, %v2009_v62  ;;  %v554_v61 = vrot.slane %v526_v45, %v2006_v60 }
 0x139   :  { %v410_v52 = vpop.f32.mrf.mxu1 }
 0x13a   :  { %663 = vadd.xlane.f32.xlu0 %v643_v54  ;;  %v411_v1 = vadd.f32 %v410_v52, %v2019_v6  ;;  %v614_v7 = vrot.slane %v554_v61, %v2009_v62 }
 0x13b   :  { %v412_v57 = vpop.f32.mrf.mxu1 }
 0x13c   :  { %v2058_v63 = vadd.f32 %v412_v57, %v2015_v2  ;;  %v645_v15 = vmul.f32 %v586_v9, %v411_v1  ;;  %v610_v57 = vrot.slane %v540_v48, %v2009_v62 }
 0x13d   :  { %v414_v3 = vpop.f32.mrf.mxu1 }
 0x13e   :  { %665 = vadd.xlane.f32.xlu0 %v644_v4  ;;  %v415_v13 = vadd.f32 %v414_v3, %v2019_v6 }
 0x13f   :  { %v416_v8 = vpop.f32.mrf.mxu1 }
 0x140   :  { %v2064_v12 = vadd.f32 %v416_v8, %v2015_v2  ;;  %v646_v25 = vmul.f32 %v590_v21, %v415_v13  ;;  %v556_v8 = vcombine.high %v540_v48, %v540_v48 }
 0x141   :  { %v420_v14 = vpop.f32.mrf.mxu1 }
 0x142   :  { %2430 = vst [vmem:[#allocation16_spill] sm:$0xff] %v2064_v12  ;;  %v421_v16 = vadd.f32 %v420_v14, %v2019_v6  ;;  %667 = vadd.xlane.f32.xlu0 %v645_v15  ;;  %v618_v15 = vrot.slane %v556_v8, %v2009_v62 }
 0x143   :  { %v422_v20 = vpop.f32.mrf.mxu1 }
 0x144   :  { %v2072_v22 = vadd.f32 %v422_v20, %v2015_v2  ;;  %v647_v23 = vmul.f32 %v594_v17, %v421_v16  ;;  %v558_v16 = vcombine.high %v554_v61, %v554_v61 }
 0x145   :  { %v424_v24 = vpop.f32.mrf.mxu1 }
 0x146   :  { %v425_v28 = vadd.f32 %v424_v24, %v2019_v6  ;;  %671 = vadd.xlane.f32.xlu1 %v647_v23  ;;  %669 = vadd.xlane.f32.xlu0 %v646_v25  ;;  %v622_v24 = vrot.slane %v558_v16, %v2009_v62 }
 0x147   :  { %v426_v31 = vpop.f32.mrf.mxu1 }
 0x148   :  { %v2077_v32 = vadd.f32 %v426_v31, %v2015_v2  ;;  %v648_v33 = vmul.f32 %v598_v29, %v425_v28  ;;  %v704_v31 = vand.u32 127, %v256_v53 }
 0x149   :  { %v430_v35 = vpop.f32.mrf.mxu1 }
 0x14a   :  { %v431_v37 = vadd.f32 %v430_v35, %v2019_v6  ;;  %673 = vadd.xlane.f32.xlu1 %v648_v33  ;;  %v2121_v35 = vsub.s32 %v704_v31, %v1997_v56 }
 0x14b   :  { %v432_v40 = vpop.f32.mrf.mxu1 }
 0x14c   :  { %v2083_v41 = vadd.f32 %v432_v40, %v2015_v2  ;;  %v649_v43 = vmul.f32 %v602_v38, %v431_v37 }
 0x14d   :  { %v434_v44 = vpop.f32.mrf.mxu1 }
 0x14e   :  { %v435_v46 = vadd.f32 %v434_v44, %v2019_v6  ;;  %675 = vadd.xlane.f32.xlu1 %v649_v43 }
 0x14f   :  { %v436_v49 = vpop.f32.mrf.mxu1 }
 0x150   :  { %v2089_v51 = vadd.f32 %v436_v49, %v2015_v2  ;;  %v650_v52 = vmul.f32 %v606_v47, %v435_v46 }
 0x151   :  { %v440_v54 = vpop.f32.mrf.mxu1 }
 0x152   :  { %v441_v55 = vadd.f32 %v440_v54, %v2019_v6  ;;  %677 = vadd.xlane.f32.xlu1 %v650_v52 }
 0x153   :  { %v442_v59 = vpop.f32.mrf.mxu1 }
 0x154   :  { %v2095_v1 = vadd.f32 %v442_v59, %v2015_v2  ;;  %v651_v3 = vmul.f32 %v610_v57, %v441_v55 }
 0x155   :  { %v444_v4 = vpop.f32.mrf.mxu1 }
 0x156   :  { %v445_v5 = vadd.f32 %v444_v4, %v2019_v6  ;;  %679 = vadd.xlane.f32.xlu1 %v651_v3 }
 0x157   :  { %v446_v9 = vpop.f32.mrf.mxu1 }
 0x158   :  { %v2100_v11 = vadd.f32 %v446_v9, %v2015_v2  ;;  %v652_v13 = vmul.f32 %v614_v7, %v445_v5 }
 0x159   :  { %v450_v14 = vpop.f32.mrf.mxu1 }
 0x15a   :  { %v451_v60 = vadd.f32 %v450_v14, %v2019_v6  ;;  %681 = vadd.xlane.f32.xlu1 %v652_v13 }
 0x15b   :  { %v452_v17 = vpop.f32.mrf.mxu1 }
 0x15c   :  { %v2105_v19 = vadd.f32 %v452_v17, %v2015_v2  ;;  %v653_v20 = vmul.f32 %v618_v15, %v451_v60 }
 0x15d   :  { %v454_v21 = vpop.f32.mrf.mxu1 }
 0x15e   :  { %v455_v23 = vadd.f32 %v454_v21, %v2019_v6  ;;  %683 = vadd.xlane.f32.xlu1 %v653_v20 }
 0x160   :  { %v654_v25 = vmul.f32 %v622_v24, %v455_v23 }
 0x162   :  { %685 = vadd.xlane.f32.xlu1 %v654_v25 }
 0x1b3   :  { %v2109_v27 = vpop.xlane.xlu0 %655 }
 0x1b4   :  { %v708_v38 = vrot.slane %v2109_v27, %v2121_v35 }
 0x1b7   :  { %v2111_v28 = vpop.xlane.xlu0 %657 }
 0x1b8   :  { %v712_v36 = vrot.slane %v2111_v28, %v2121_v35 }
 0x1ba   :  { %v770_v43 = vsel %vm769_vm1, %v712_v36, %v708_v38 }
 0x1bb   :  { %v2113_v29 = vpop.xlane.xlu0 %659 }
 0x1bc   :  { %v716_v37 = vrot.slane %v2113_v29, %v2121_v35 }
 0x1be   :  { %v772_v45 = vsel %vm771_vm2, %v716_v37, %v770_v43  ;;  %v2194_v43 = vsub.s32 2, %v1997_v56 }
 0x1bf   :  { %v2115_v30 = vpop.xlane.xlu0 %661 }
 0x1c0   :  { %v720_v53 = vrot.slane %v2115_v30, %v2121_v35 }
 0x1c2   :  { %v774_v47 = vsel %vm773_vm3, %v720_v53, %v772_v45 }
 0x1c3   :  { %v2118_v33 = vpop.xlane.xlu0 %663 }
 0x1c4   :  { %v724_v39 = vrot.slane %v2118_v33, %v2121_v35 }
 0x1c6   :  { %v776_v49 = vsel %vm775_vm4, %v724_v39, %v774_v47 }
 0x1c7   :  { %v2123_v6 = vpop.xlane.xlu0 %665 }
 0x1c8   :  { %v728_v44 = vrot.slane %v2123_v6, %v2121_v35 }
 0x1ca   :  { %v778_v55 = vsel %vm777_vm5, %v728_v44, %v776_v49  ;;  %v2197_v44 = vsub.s32 3, %v1997_v56 }
 0x1cb   :  { %v2135_v40 = vpop.xlane.xlu0 %667 }
 0x1cc   :  { %v732_v46 = vrot.slane %v2135_v40, %v2121_v35 }
 0x1ce   :  { %v780_v57 = vsel %vm779_vm6, %v732_v46, %v778_v55 }
 0x1cf   :  { %v2144_v48 = vpop.xlane.xlu1 %671  ;;  %v2147_v52 = vpop.xlane.xlu0 %669 }
 0x1d0   :  { %v736_v54 = vrot.slane %v2147_v52, %v2121_v35  ;;  %v740_v14 = vrot.slane %v2144_v48, %v2121_v35 }
 0x1d2   :  { %v782_v59 = vsel %vm781_vm7, %v736_v54, %v780_v57  ;;  %v2210_v57 = vsub.s32 4, %v1997_v56 }
 0x1d3   :  { %v2153_v61 = vpop.xlane.xlu1 %673  ;;  %v793_v3 = vsel %vm792_vm8, %v782_v59, -inf }
 0x1d4   :  { %794 = vmax.xlane.f32.xlu0 %v793_v3  ;;  %v744_v9 = vrot.slane %v2153_v61, %v2121_v35 }
 0x1d6   :  { %v783_v17 = vsel %vm769_vm1, %v744_v9, %v740_v14  ;;  %v2216_v14 = vsub.s32 5, %v1997_v56 }
 0x1d7   :  { %v2157_v4 = vpop.xlane.xlu1 %675 }
 0x1d8   :  { %v748_v13 = vrot.slane %v2157_v4, %v2121_v35 }
 0x1da   :  { %v784_v21 = vsel %vm771_vm2, %v748_v13, %v783_v17 }
 0x1db   :  { %v2159_v5 = vpop.xlane.xlu1 %677 }
 0x1dc   :  { %v752_v60 = vrot.slane %v2159_v5, %v2121_v35 }
 0x1de   :  { %v785_v24 = vsel %vm773_vm3, %v752_v60, %v784_v21 }
 0x1df   :  { %v2161_v7 = vpop.xlane.xlu1 %679 }
 0x1e0   :  { %v756_v15 = vrot.slane %v2161_v7, %v2121_v35 }
 0x1e2   :  { %v786_v25 = vsel %vm775_vm4, %v756_v15, %v785_v24  ;;  %v2222_v15 = vsub.s32 6, %v1997_v56 }
 0x1e3   :  { %v2163_v8 = vpop.xlane.xlu1 %681 }
 0x1e4   :  { %v760_v20 = vrot.slane %v2163_v8, %v2121_v35 }
 0x1e6   :  { %v787_v37 = vsel %vm777_vm5, %v760_v20, %v786_v25 }
 0x1e7   :  { %v2175_v16 = vpop.xlane.xlu1 %683 }
 0x1e8   :  { %v764_v23 = vrot.slane %v2175_v16, %v2121_v35 }
 0x1ea   :  { %v788_v38 = vsel %vm779_vm6, %v764_v23, %v787_v37 }
 0x1eb   :  { %v2185_v31 = vpop.xlane.xlu1 %685 }
 0x1ec   :  { %v768_v36 = vrot.slane %v2185_v31, %v2121_v35 }
 0x1ee   :  { %v789_v53 = vsel %vm781_vm7, %v768_v36, %v788_v38 }
 0x1ef   :  { %v796_v39 = vsel %vm792_vm8, %v789_v53, -inf }
 0x1f0   :  { %797 = vmax.xlane.f32.xlu1 %v796_v39 }
 0x25d   :  { %v2199_v45 = vpop.xlane.xlu0 %794 }
 0x25e   :  { %v804_v46 = vrot.slane %v2199_v45, %v2009_v62  ;;  %v808_v47 = vrot.slane %v2199_v45, %v2000_v58  ;;  %v812_v49 = vrot.slane %v2199_v45, %v2194_v43  ;;  %v816_v59 = vrot.slane %v2199_v45, %v2197_v44 }
 0x25f   :  { %v820_v60 = vrot.slane %v2199_v45, %v2210_v57  ;;  %v824_v17 = vrot.slane %v2199_v45, %v2216_v14  ;;  %v828_v21 = vrot.slane %v2199_v45, %v2222_v15 }
 0x260   :  { %v881_v54 = vsub.f32 %v2109_v27, %v804_v46  ;;  %v882_v55 = vsub.f32 %v2111_v28, %v808_v47  ;;  %v883_v3 = vsub.f32 %v2113_v29, %v812_v49  ;;  %v884_v27 = vsub.f32 %v2115_v30, %v816_v59 }
 0x261   :  { %v885_v29 = vsub.f32 %v2118_v33, %v820_v60  ;;  %v886_v23 = vsub.f32 %v2123_v6, %v824_v17  ;;  %v887_v25 = vsub.f32 %v2135_v40, %v828_v21 }
 0x262   :  { %v897_v9 = vmul.f32 1.442695, %v881_v54  ;;  %v899_v13 = vmul.f32 1.442695, %v882_v55  ;;  %v901_v28 = vmul.f32 1.442695, %v883_v3 }
 0x263   :  { %v903_v20 = vmul.f32 1.442695, %v884_v27  ;;  %v905_v24 = vmul.f32 1.442695, %v885_v29  ;;  %v907_v36 = vmul.f32 1.442695, %v886_v23 }
 0x264   :  { %1724 = vpow2.f32 %v897_v9  ;;  %v909_v33 = vmul.f32 1.442695, %v887_v25 }
 0x265   :  { %1726 = vpow2.f32 %v899_v13  ;;  %v2254_v13 = vsub.s32 7, %v1997_v56 }
 0x266   :  { %1728 = vpow2.f32 %v901_v28 }
 0x267   :  { %1730 = vpow2.f32 %v903_v20  ;;  %v832_v29 = vrot.slane %v2199_v45, %v2254_v13 }
 0x268   :  { %1732 = vpow2.f32 %v905_v24 }
 0x269   :  { %1734 = vpow2.f32 %v907_v36  ;;  %v888_v24 = vsub.f32 %v2147_v52, %v832_v29 }
 0x26a   :  { %1736 = vpow2.f32 %v909_v33 }
 0x26b   :  { %v911_v36 = vmul.f32 1.442695, %v888_v24 }
 0x271   :  { %v2230_v30 = vpop.eup %1724 }
 0x272   :  { %v2233_v37 = vpop.eup %1726  ;;  %946 = vperm.xlu0 %1682, %v2230_v30  }
 0x273   :  { %949 = vperm.xlu1 %1683, %v2233_v37   ;;  %v2237_v38 = vpop.eup %1728 }
 0x274   :  { %v2242_v39 = vpop.eup %1730 }
 0x275   :  { %v2251_v9 = vpop.eup %1732 }
 0x277   :  { %952 = vperm.xlu1 %1683, %v2237_v38  }
 0x279   :  { %v798_v6 = vpop.xlane.xlu1 %797 }
 0x27a   :  { %v836_v53 = vrot.slane %v798_v6, %v2009_v62  ;;  %v840_v40 = vrot.slane %v798_v6, %v2000_v58  ;;  %v844_v46 = vrot.slane %v798_v6, %v2194_v43  ;;  %v852_v47 = vrot.slane %v798_v6, %v2210_v57 }
 0x27b   :  { %v856_v49 = vrot.slane %v798_v6, %v2216_v14  ;;  %955 = vperm.xlu1 %1683, %v2242_v39   ;;  %v848_v60 = vrot.slane %v798_v6, %v2197_v44  ;;  %v860_v17 = vrot.slane %v798_v6, %v2222_v15 }
 0x27c   :  { %v889_v54 = vsub.f32 %v2144_v48, %v836_v53  ;;  %v890_v55 = vsub.f32 %v2153_v61, %v840_v40  ;;  %v893_v59 = vsub.f32 %v2161_v7, %v852_v47  ;;  %v891_v27 = vsub.f32 %v2157_v4, %v844_v46  ;;  %v2261_v7 = vpop.eup %1734 }
 0x27d   :  { %v894_v48 = vsub.f32 %v2163_v8, %v856_v49  ;;  %v892_v56 = vsub.f32 %v2159_v5, %v848_v60  ;;  %v864_v4 = vrot.slane %v798_v6, %v2254_v13  ;;  %v895_v21 = vsub.f32 %v2175_v16, %v860_v17  ;;  %v2269_v8 = vpop.eup %1736 }
 0x27e   :  { %v913_v3 = vmul.f32 1.442695, %v889_v54  ;;  %v915_v28 = vmul.f32 1.442695, %v890_v55  ;;  %v921_v61 = vmul.f32 1.442695, %v893_v59 }
 0x27f   :  { %958 = vperm.xlu1 %1683, %v2251_v9   ;;  %v917_v20 = vmul.f32 1.442695, %v891_v27  ;;  %v923_v23 = vmul.f32 1.442695, %v894_v48  ;;  %v919_v25 = vmul.f32 1.442695, %v892_v56  ;;  %v896_v45 = vsub.f32 %v2185_v31, %v864_v4 }
 0x280   :  { %1738 = vpow2.f32 %v913_v3  ;;  %v925_v5 = vmul.f32 1.442695, %v895_v21 }
 0x281   :  { %1740 = vpow2.f32 %v915_v28  ;;  %v927_v16 = vmul.f32 1.442695, %v896_v45 }
 0x282   :  { %1742 = vpow2.f32 %v921_v61 }
 0x283   :  { %961 = vperm.xlu1 %1683, %v2261_v7   ;;  %1744 = vpow2.f32 %v917_v20 }
 0x284   :  { %1746 = vpow2.f32 %v923_v23 }
 0x285   :  { %1748 = vpow2.f32 %v919_v25 }
 0x286   :  { %1750 = vpow2.f32 %v925_v5 }
 0x287   :  { %964 = vperm.xlu1 %1683, %v2269_v8   ;;  %1752 = vpow2.f32 %v911_v36 }
 0x288   :  { %1754 = vpow2.f32 %v927_v16 }
 0x28d   :  { %v2274_v33 = vpop.eup %1738 }
 0x28e   :  { %970 = vperm.xlu1 %1683, %v2274_v33   ;;  %v2277_v6 = vpop.eup %1740 }
 0x28f   :  { %v2279_v52 = vpop.eup %1742 }
 0x290   :  { %982 = vperm.xlu0 %1682, %v2279_v52   ;;  %v2283_v31 = vpop.eup %1744 }
 0x291   :  { %v2285_v53 = vpop.eup %1746 }
 0x292   :  { %973 = vperm.xlu1 %1683, %v2277_v6   ;;  %v2289_v40 = vpop.eup %1748 }
 0x293   :  { %v2291_v46 = vpop.eup %1750 }
 0x294   :  { %985 = vperm.xlu0 %1682, %v2285_v53   ;;  %v2295_v47 = vpop.eup %1752 }
 0x295   :  { %v2297_v49 = vpop.eup %1754 }
 0x296   :  { %976 = vperm.xlu1 %1683, %v2283_v31  }
 0x298   :  { %988 = vperm.xlu0 %1682, %v2291_v46  }
 0x29a   :  { %979 = vperm.xlu1 %1683, %v2289_v40  }
 0x29c   :  { %991 = vperm.xlu0 %1682, %v2297_v49  }
 0x29e   :  { %967 = vperm.xlu1 %1683, %v2295_v47  }
 0x2ed   :  { %v947_v28 = vpop.permute.xlu0 %946 }
 0x2ee   :  { %v950_v54 = vpop.permute.xlu1 %949  ;;  %v996_v20 = vrot.slane %v947_v28, %v2121_v35 }
 0x2ef   :  { %v1000_v4 = vrot.slane %v950_v54, %v2121_v35 }
 0x2f1   :  { %v1057_v0 = vsel %vm769_vm1, %v1000_v4, %v996_v20 }
 0x2f2   :  { %v953_v55 = vpop.permute.xlu1 %952 }
 0x2f3   :  { %v1004_v23 = vrot.slane %v953_v55, %v2121_v35 }
 0x2f5   :  { %v1058_v55 = vsel %vm771_vm2, %v1004_v23, %v1057_v0 }
 0x2f6   :  { %v956_v59 = vpop.permute.xlu1 %955 }
 0x2f7   :  { %v1008_v25 = vrot.slane %v956_v59, %v2121_v35 }
 0x2fa   :  { %v959_v3 = vpop.permute.xlu1 %958 }
 0x2fb   :  { %v1012_v5 = vrot.slane %v959_v3, %v2121_v35  ;;  %v1059_v3 = vsel %vm773_vm3, %v1008_v25, %v1058_v55 }
 0x2fe   :  { %v962_v60 = vpop.permute.xlu1 %961 }
 0x2ff   :  { %v1016_v28 = vrot.slane %v962_v60, %v2121_v35  ;;  %v1060_v60 = vsel %vm775_vm4, %v1012_v5, %v1059_v3 }
 0x302   :  { %v965_v27 = vpop.permute.xlu1 %964 }
 0x309   :  { %v971_v17 = vpop.permute.xlu1 %970 }
 0x30a   :  { %v1028_v45 = vrot.slane %v971_v17, %v2121_v35 }
 0x30b   :  { %v983_v48 = vpop.permute.xlu0 %982 }
 0x30c   :  { %v1044_v59 = vrot.slane %v983_v48, %v2121_v35 }
 0x30d   :  { %v974_v61 = vpop.permute.xlu1 %973 }
 0x30e   :  { %v1032_v21 = vrot.slane %v974_v61, %v2121_v35 }
 0x30f   :  { %v986_v29 = vpop.permute.xlu0 %985 }
 0x310   :  { %v1064_v54 = vsel %vm769_vm1, %v1032_v21, %v1028_v45  ;;  %v1048_v12 = vrot.slane %v986_v29, %v2121_v35 }
 0x311   :  { %v977_v56 = vpop.permute.xlu1 %976 }
 0x312   :  { %v1036_v24 = vrot.slane %v977_v56, %v2121_v35  ;;  %v1020_v56 = vrot.slane %v965_v27, %v2121_v35  ;;  %v1061_v27 = vsel %vm777_vm5, %v1016_v28, %v1060_v60 }
 0x313   :  { %v989_v36 = vpop.permute.xlu0 %988 }
 0x314   :  { %v1065_v17 = vsel %vm771_vm2, %v1036_v24, %v1064_v54  ;;  %v1052_v4 = vrot.slane %v989_v36, %v2121_v35  ;;  %v1062_v25 = vsel %vm779_vm6, %v1020_v56, %v1061_v27 }
 0x315   :  { %v980_v16 = vpop.permute.xlu1 %979 }
 0x316   :  { %v1040_v61 = vrot.slane %v980_v16, %v2121_v35 }
 0x317   :  { %v992_v21 = vpop.permute.xlu0 %991 }
 0x318   :  { %v1066_v20 = vsel %vm773_vm3, %v1040_v61, %v1065_v17  ;;  %v1056_v48 = vrot.slane %v992_v21, %v2121_v35 }
 0x319   :  { %v1067_v45 = vsel %vm775_vm4, %v1044_v59, %v1066_v20  ;;  %v968_v0 = vpop.permute.xlu1 %967 }
 0x31a   :  { %v1024_v23 = vrot.slane %v968_v0, %v2121_v35  ;;  %v1068_v24 = vsel %vm777_vm5, %v1048_v12, %v1067_v45 }
 0x31b   :  { %v1069_v29 = vsel %vm779_vm6, %v1052_v4, %v1068_v24  ;;  %v1716_v24 = vld [vmem:[#allocation10 + $0x38] sm:$0xff]  }
 0x31c   :  { %v1070_v5 = vsel %vm781_vm7, %v1056_v48, %v1069_v29  ;;  %v1063_v36 = vsel %vm781_vm7, %v1024_v23, %v1062_v25  ;;  %1649 = vmatpush3.bf16.msra.mxu0 %v1716_v24  ;;  %v2431_v29 = vmov 0.0   ;;  %v1718_v25 = vld [vmem:[#allocation10 + $0x28] sm:$0xff]  }
 0x31d   :  { %v1076_v16 = vsel %vm792_vm8, %v1070_v5, 0.0  ;;  %v1073_v54 = vsel %vm792_vm8, %v1063_v36, 0.0  ;;  %1650 = vmatprep.subr.bf16.mxu0 %v2431_v29 }
 0x31e   :  { %1077 = vadd.xlane.f32.xlu0 %v1076_v16  ;;  %1074 = vadd.xlane.f32.xlu1 %v1073_v54 }
 0x3a7   :  { %v1078_v28 = vpop.xlane.xlu0 %1077  ;;  %v1075_v61 = vpop.xlane.xlu1 %1074 }
 0x3a8   :  { %1756 = vrcp.f32 %v1078_v28 }
 0x3a9   :  { %1758 = vrcp.f32 %v1075_v61 }
 0x3b5   :  { %v1757_v35 = vpop.eup %1756 }
 0x3b6   :  { %v1759_v12 = vpop.eup %1758  ;;  %v1122_v20 = vrot.slane %v1757_v35, %v2000_v58  ;;  %v1126_v45 = vrot.slane %v1757_v35, %v2194_v43  ;;  %v1118_v48 = vrot.slane %v1757_v35, %v2009_v62 }
 0x3b7   :  { %v1090_v55 = vrot.slane %v1759_v12, %v2000_v58  ;;  %v1086_v56 = vrot.slane %v1759_v12, %v2009_v62  ;;  %v1094_v3 = vrot.slane %v1759_v12, %v2194_v43  ;;  %v1098_v21 = vrot.slane %v1759_v12, %v2197_v44 }
 0x3b8   :  { %v1172_v4 = vmul.f32 %v2277_v6, %v1122_v20  ;;  %v1102_v0 = vrot.slane %v1759_v12, %v2210_v57  ;;  %v1130_v58 = vrot.slane %v1757_v35, %v2197_v44  ;;  %v1106_v27 = vrot.slane %v1759_v12, %v2216_v14 }
 0x3b9   :  { %v1164_v59 = vmul.f32 %v2233_v37, %v1090_v55  ;;  %v1163_v17 = vmul.f32 %v2230_v30, %v1086_v56  ;;  %v1165_v60 = vmul.f32 %v2237_v38, %v1094_v3  ;;  %v1166_v37 = vmul.f32 %v2242_v39, %v1098_v21 }
 0x3ba   :  { %v1173_v30 = vmul.f32 %v2283_v31, %v1126_v45  ;;  %v1167_v38 = vmul.f32 %v2251_v9, %v1102_v0  ;;  %v1174_v6 = vmul.f32 %v2289_v40, %v1130_v58  ;;  %v1134_v43 = vrot.slane %v1757_v35, %v2210_v57 }
 0x3bb   :  { %1186 = vperm.xlu1 %1683, %v1164_v59   ;;  %1181 = vperm.xlu0 %1682, %v1163_v17   ;;  %v1168_v39 = vmul.f32 %v2261_v7, %v1106_v27  ;;  %v1138_v44 = vrot.slane %v1757_v35, %v2216_v14  ;;  %v1171_v9 = vmul.f32 %v2274_v33, %v1118_v48  ;;  %v1717_v33 = vld [vmem:[#allocation10 + $0x30] sm:$0xff]  }
 0x3bc   :  { %v1175_v31 = vmul.f32 %v2279_v52, %v1134_v43  ;;  %v1110_v23 = vrot.slane %v1759_v12, %v2222_v15  ;;  %v1142_v57 = vrot.slane %v1757_v35, %v2222_v15  ;;  %v1114_v14 = vrot.slane %v1759_v12, %v2254_v13  ;;  %1651 = vmatpush3.bf16.msra.mxu0 %v1717_v33 }
 0x3bd   :  { %v1176_v40 = vmul.f32 %v2285_v53, %v1138_v44  ;;  %v1146_v52 = vrot.slane %v1757_v35, %v2254_v13  ;;  %1652 = vmatprep.subr.bf16.mxu0 %v2431_v29  ;;  %v1720_v13 = vld [vmem:[#allocation10 + $0x18] sm:$0xff]  }
 0x3be   :  { %v1169_v7 = vmul.f32 %v2269_v8, %v1110_v23  ;;  %v1177_v62 = vmul.f32 %v2291_v46, %v1142_v57  ;;  %v1170_v15 = vmul.f32 %v2295_v47, %v1114_v14  ;;  %v1719_v8 = vld [vmem:[#allocation10 + $0x20] sm:$0xff]   ;;  %v1721_v46 = vld [vmem:[#allocation10 + $0x10] sm:$0xff]   ;;  %v1722_v47 = vld [vmem:[#allocation10 + $0x8] sm:$0xff]  }
 0x3bf   :  { %1191 = vperm.xlu1 %1683, %v1165_v60   ;;  %1226 = vperm.xlu0 %1682, %v1172_v4   ;;  %v1178_v53 = vmul.f32 %v2297_v49, %v1146_v52  ;;  %v1723_v49 = vld [vmem:[#allocation10] sm:$0xff]  }
 0x3c0   :  { %1653 = vmatpush3.bf16.msra.mxu0 %v1718_v25 }
 0x3c1   :  { %1654 = vmatprep.subr.bf16.mxu0 %v2431_v29 }
 0x3c3   :  { %1196 = vperm.xlu1 %1683, %v1166_v37   ;;  %1231 = vperm.xlu0 %1682, %v1173_v30  }
 0x3c4   :  { %1655 = vmatpush3.bf16.msra.mxu0 %v1719_v8 }
 0x3c5   :  { %1656 = vmatprep.subr.bf16.mxu0 %v2431_v29 }
 0x3c7   :  { %1201 = vperm.xlu1 %1683, %v1167_v38   ;;  %1236 = vperm.xlu0 %1682, %v1174_v6  }
 0x3c8   :  { %1657 = vmatpush3.bf16.msra.mxu0 %v1720_v13 }
 0x3c9   :  { %1658 = vmatprep.subr.bf16.mxu0 %v2431_v29 }
 0x3cb   :  { %1206 = vperm.xlu1 %1683, %v1168_v39   ;;  %1241 = vperm.xlu0 %1682, %v1175_v31  }
 0x3cc   :  { %1659 = vmatpush3.bf16.msra.mxu0 %v1721_v46 }
 0x3cd   :  { %1660 = vmatprep.subr.bf16.mxu0 %v2431_v29 }
 0x3cf   :  { %1221 = vperm.xlu1 %1683, %v1171_v9   ;;  %1246 = vperm.xlu0 %1682, %v1176_v40  }
 0x3d0   :  { %1661 = vmatpush3.bf16.msra.mxu0 %v1722_v47 }
 0x3d1   :  { %1662 = vmatprep.subr.bf16.mxu0 %v2431_v29 }
 0x3d3   :  { %1211 = vperm.xlu1 %1683, %v1169_v7   ;;  %1251 = vperm.xlu0 %1682, %v1177_v62  }
 0x3d4   :  { %1663 = vmatpush3.bf16.msra.mxu0 %v1723_v49 }
 0x3d7   :  { %1216 = vperm.xlu1 %1683, %v1170_v15   ;;  %1256 = vperm.xlu0 %1682, %v1178_v53  }
 0x436   :  { %v1187_v5 = vpop.permute.xlu1 %1186  ;;  %v1182_v36 = vpop.permute.xlu0 %1181 }
 0x437   :  { %v1260_v16 = vmul.f32 %v1187_v5, %v2029_v18  ;;  %v1259_v54 = vmul.f32 %v1182_v36, %v2022_v10 }
 0x439   :  { %v1281_v28 = vrot.slane %v1260_v16, 4  ;;  %v1275_v61 = vrot.slane %v1259_v54, 4 }
 0x43a   :  { %v1192_v35 = vpop.permute.xlu1 %1191  ;;  %v1227_v12 = vpop.permute.xlu0 %1226 }
 0x43b   :  { %v1282_v55 = vadd.f32 %v1281_v28, %v1260_v16  ;;  %v1276_v56 = vadd.f32 %v1275_v61, %v1259_v54  ;;  %v1261_v59 = vmul.f32 %v1192_v35, %v2034_v26  ;;  %v1268_v17 = vmul.f32 %v1227_v12, %v2077_v32 }
 0x43d   :  { %v1283_v3 = vrot.slane %v1282_v55, 2  ;;  %v1277_v20 = vrot.slane %v1276_v56, 2  ;;  %v1287_v60 = vrot.slane %v1261_v59, 4  ;;  %v1329_v4 = vrot.slane %v1268_v17, 4 }
 0x43e   :  { %v1197_v21 = vpop.permute.xlu1 %1196  ;;  %v1232_v45 = vpop.permute.xlu0 %1231 }
 0x43f   :  { %v1284_v37 = vadd.f32 %v1283_v3, %v1282_v55  ;;  %v1278_v18 = vadd.f32 %v1277_v20, %v1276_v56  ;;  %v1288_v30 = vadd.f32 %v1287_v60, %v1261_v59  ;;  %v1330_v10 = vadd.f32 %v1329_v4, %v1268_v17  ;;  %v456_v56 = vpop.f32.mrf.mxu1 }
 0x440   :  { %v1262_v0 = vmul.f32 %v1197_v21, %v2040_v34  ;;  %v1269_v58 = vmul.f32 %v1232_v45, %v2083_v41 }
 0x441   :  { %v1285_v38 = vrot.slane %v1284_v37, 1  ;;  %v1279_v6 = vrot.slane %v1278_v18, 1  ;;  %v1289_v27 = vrot.slane %v1288_v30, 2  ;;  %v1331_v26 = vrot.slane %v1330_v10, 2 }
 0x442   :  { %v1293_v43 = vrot.slane %v1262_v0, 4  ;;  %v1335_v32 = vrot.slane %v1269_v58, 4  ;;  %v1202_v39 = vpop.permute.xlu1 %1201  ;;  %v1237_v31 = vpop.permute.xlu0 %1236 }
 0x443   :  { %v1286_v48 = vadd.f32 %v1285_v38, %v1284_v37  ;;  %v1280_v44 = vadd.f32 %v1279_v6, %v1278_v18  ;;  %v1290_v9 = vadd.f32 %v1289_v27, %v1288_v30  ;;  %v1332_v40 = vadd.f32 %v1331_v26, %v1330_v10 }
 0x444   :  { %v1294_v23 = vadd.f32 %v1293_v43, %v1262_v0  ;;  %v1336_v57 = vadd.f32 %v1335_v32, %v1269_v58  ;;  %v1263_v24 = vmul.f32 %v1202_v39, %v2046_v42  ;;  %v1270_v34 = vmul.f32 %v1237_v31, %v2089_v51 }
 0x445   :  { %v1372_v7 = vpack.c.bf16 %v1286_v48, %v1286_v48  ;;  %v1371_v41 = vpack.c.bf16 %v1280_v44, %v1280_v44  ;;  %v1291_v62 = vrot.slane %v1290_v9, 1  ;;  %v1333_v46 = vrot.slane %v1332_v40, 1 }
 0x446   :  { %v1295_v14 = vrot.slane %v1294_v23, 2  ;;  %v1337_v52 = vrot.slane %v1336_v57, 2  ;;  %v1299_v29 = vrot.slane %v1263_v24, 4  ;;  %v1341_v33 = vrot.slane %v1270_v34, 4  ;;  %v1207_v15 = vpop.permute.xlu1 %1206  ;;  %v1242_v53 = vpop.permute.xlu0 %1241 }
 0x447   :  { %v1427_v25 = vunpack.c.l.b16 %v1372_v7  ;;  %v1426_v8 = vunpack.c.l.b16 %v1371_v41  ;;  %v1292_v13 = vadd.f32 %v1291_v62, %v1290_v9  ;;  %v1264_v16 = vmul.f32 %v1207_v15, %v2052_v50 }
 0x448   :  { %v1296_v47 = vadd.f32 %v1295_v14, %v1294_v23  ;;  %v1338_v49 = vadd.f32 %v1337_v52, %v1336_v57  ;;  %v1300_v5 = vadd.f32 %v1299_v29, %v1263_v24  ;;  %v1342_v36 = vadd.f32 %v1341_v33, %v1270_v34 }
 0x449   :  { %v1442_v42 = vsel %vm769_vm1, %v1427_v25, %v1426_v8  ;;  %v1373_v51 = vpack.c.bf16 %v1292_v13, %v1292_v13  ;;  %v1305_v17 = vrot.slane %v1264_v16, 4  ;;  %v1271_v3 = vmul.f32 %v1242_v53, %v2095_v1 }
 0x44a   :  { %v1297_v54 = vrot.slane %v1296_v47, 1  ;;  %v1339_v28 = vrot.slane %v1338_v49, 1  ;;  %v1301_v61 = vrot.slane %v1300_v5, 2  ;;  %v1343_v35 = vrot.slane %v1342_v36, 2  ;;  %v1222_v12 = vpop.permute.xlu1 %1221  ;;  %v1247_v55 = vpop.permute.xlu0 %1246 }
 0x44b   :  { %v1428_v59 = vunpack.c.l.b16 %v1373_v51  ;;  %v2383_v20 = vadd.f32 %v1333_v46, %v1332_v40  ;;  %v1306_v37 = vadd.f32 %v1305_v17, %v1264_v16  ;;  %v1347_v50 = vrot.slane %v1271_v3, 4 }
 0x44c   :  { %v1298_v60 = vadd.f32 %v1297_v54, %v1296_v47  ;;  %v1302_v4 = vadd.f32 %v1301_v61, %v1300_v5  ;;  %v1344_v21 = vadd.f32 %v1343_v35, %v1342_v36  ;;  %v1267_v18 = vmul.f32 %v1222_v12, %v2072_v22 }
 0x44d   :  { %v1443_v45 = vsel %vm771_vm2, %v1428_v59, %v1442_v42  ;;  %v457_v30 = vadd.f32 %v456_v56, %v2015_v2  ;;  %v2388_v0 = vadd.f32 %v1339_v28, %v1338_v49  ;;  %v1307_v6 = vrot.slane %v1306_v37, 2 }
 0x44e   :  { %v1374_v10 = vpack.c.bf16 %v1298_v60, %v1298_v60  ;;  %v1303_v58 = vrot.slane %v1302_v4, 1  ;;  %v1212_v38 = vpop.permute.xlu1 %1211  ;;  %v1348_v1 = vadd.f32 %v1347_v50, %v1271_v3  ;;  %v1323_v27 = vrot.slane %v1267_v18, 4  ;;  %v1252_v43 = vpop.permute.xlu0 %1251 }
 0x44f   :  { %v1272_v26 = vmul.f32 %v1247_v55, %v2100_v11  ;;  %v1380_v32 = vpack.c.bf16 %v2383_v20, %v2383_v20  ;;  %v1345_v48 = vrot.slane %v1344_v21, 1  ;;  %v1308_v22 = vadd.f32 %v1307_v6, %v1306_v37 }
 0x450   :  { %v1429_v39 = vunpack.c.l.b16 %v1374_v10  ;;  %v1304_v31 = vadd.f32 %v1303_v58, %v1302_v4  ;;  %v1349_v44 = vrot.slane %v1348_v1, 2  ;;  %v1324_v2 = vadd.f32 %v1323_v27, %v1267_v18 }
 0x451   :  { %v1353_v9 = vrot.slane %v1272_v26, 4  ;;  %v1381_v23 = vpack.c.bf16 %v2388_v0, %v2388_v0  ;;  %v1265_v24 = vmul.f32 %v1212_v38, %v2058_v63  ;;  %v1309_v11 = vrot.slane %v1308_v22, 1  ;;  %v2432_v63 = vld [vmem:[#allocation16_spill] sm:$0xff] }
 0x452   :  { %v1444_v40 = vsel %vm773_vm3, %v1429_v39, %v1443_v45  ;;  %v1375_v57 = vpack.c.bf16 %v1304_v31, %v1304_v31  ;;  %v1350_v34 = vadd.f32 %v1349_v44, %v1348_v1  ;;  %v1325_v7 = vrot.slane %v1324_v2, 2  ;;  %v1217_v62 = vpop.permute.xlu1 %1216  ;;  %v1257_v13 = vpop.permute.xlu0 %1256 }
 0x453   :  { %v1354_v41 = vadd.f32 %v1353_v9, %v1272_v26  ;;  %v1346_v52 = vadd.f32 %v1345_v48, %v1344_v21  ;;  %v1311_v29 = vrot.slane %v1265_v24, 4  ;;  %v1273_v33 = vmul.f32 %v1252_v43, %v2105_v19 }
 0x454   :  { %v1430_v14 = vunpack.c.l.b16 %v1375_v57  ;;  %v1310_v15 = vadd.f32 %v1309_v11, %v1308_v22  ;;  %v1351_v53 = vrot.slane %v1350_v34, 1  ;;  %v1326_v25 = vadd.f32 %v1325_v7, %v1324_v2 }
 0x455   :  { %v1355_v8 = vrot.slane %v1354_v41, 2  ;;  %v1312_v47 = vadd.f32 %v1311_v29, %v1265_v24  ;;  %v1359_v49 = vrot.slane %v1273_v33, 4  ;;  %v1266_v5 = vmul.f32 %v1217_v62, %v2432_v63 }
 0x456   :  { %v1445_v46 = vsel %vm775_vm4, %v1430_v14, %v1444_v40  ;;  %v1376_v36 = vpack.c.bf16 %v1310_v15, %v1310_v15  ;;  %v1352_v42 = vadd.f32 %v1351_v53, %v1350_v34  ;;  %v1327_v51 = vrot.slane %v1326_v25, 1 }
 0x457   :  { %v1356_v16 = vadd.f32 %v1355_v8, %v1354_v41  ;;  %v1313_v54 = vrot.slane %v1312_v47, 2  ;;  %v1360_v28 = vadd.f32 %v1359_v49, %v1273_v33  ;;  %v1317_v61 = vrot.slane %v1266_v5, 4 }
 0x458   :  { %v1274_v35 = vmul.f32 %v1257_v13, %v457_v30  ;;  %v1382_v19 = vpack.c.bf16 %v1346_v52, %v1346_v52  ;;  %v1431_v12 = vunpack.c.l.b16 %v1376_v36  ;;  %v1328_v55 = vadd.f32 %v1327_v51, %v1326_v25 }
 0x459   :  { %v1357_v56 = vrot.slane %v1356_v16, 1  ;;  %v1314_v59 = vadd.f32 %v1313_v54, %v1312_v47  ;;  %v1361_v17 = vrot.slane %v1360_v28, 2  ;;  %v1318_v3 = vadd.f32 %v1317_v61, %v1266_v5  ;;  %v1760_v5 = vld [vmem:[#allocation11] sm:$0xff]  ;;  %v1761_v54 = vld [vmem:[#allocation11 + $0x8] sm:$0xff] }
 0x45a   :  { %v1365_v20 = vrot.slane %v1274_v35, 4  ;;  %v1446_v60 = vsel %vm777_vm5, %v1431_v12, %v1445_v46  ;;  %v1383_v4 = vpack.c.bf16 %v1352_v42, %v1352_v42  ;;  %v1379_v21 = vpack.c.bf16 %v1328_v55, %v1328_v55  ;;  %v1601_v46 = vld [vmem:[%s2426_s7] ss:$0 sm:$0xff] }
 0x45b   :  { %v1358_v45 = vadd.f32 %v1357_v56, %v1356_v16  ;;  %v1315_v37 = vrot.slane %v1314_v59, 1  ;;  %v1362_v50 = vadd.f32 %v1361_v17, %v1360_v28  ;;  %v1319_v18 = vrot.slane %v1318_v3, 2 }
 0x45c   :  { %v1366_v10 = vadd.f32 %v1365_v20, %v1274_v35  ;;  %v1435_v0 = vunpack.c.l.b16 %v1380_v32  ;;  %v1436_v58 = vunpack.c.l.b16 %v1381_v23  ;;  %v1434_v30 = vunpack.c.l.b16 %v1379_v21 }
 0x45d   :  { %v1384_v38 = vpack.c.bf16 %v1358_v45, %v1358_v45  ;;  %v1316_v6 = vadd.f32 %v1315_v37, %v1314_v59  ;;  %v1363_v1 = vrot.slane %v1362_v50, 1  ;;  %v1320_v27 = vadd.f32 %v1319_v18, %v1318_v3 }
 0x45e   :  { %v1367_v26 = vrot.slane %v1366_v10, 2  ;;  %v1437_v43 = vunpack.c.l.b16 %v1382_v19  ;;  %v1438_v39 = vunpack.c.l.b16 %v1383_v4  ;;  %v1449_v31 = vsel %vm769_vm1, %v1435_v0, %v1434_v30 }
 0x45f   :  { %v1450_v48 = vsel %vm771_vm2, %v1436_v58, %v1449_v31  ;;  %v1377_v22 = vpack.c.bf16 %v1316_v6, %v1316_v6  ;;  %v1364_v44 = vadd.f32 %v1363_v1, %v1362_v50  ;;  %v1321_v2 = vrot.slane %v1320_v27, 1 }
 0x460   :  { %v1451_v9 = vsel %vm773_vm3, %v1437_v43, %v1450_v48  ;;  %v1439_v40 = vunpack.c.l.b16 %v1384_v38  ;;  %v1368_v32 = vadd.f32 %v1367_v26, %v1366_v10 }
 0x461   :  { %v1452_v23 = vsel %vm775_vm4, %v1438_v39, %v1451_v9  ;;  %v1432_v57 = vunpack.c.l.b16 %v1377_v22  ;;  %v1385_v24 = vpack.c.bf16 %v1364_v44, %v1364_v44  ;;  %v1322_v11 = vadd.f32 %v1321_v2, %v1320_v27 }
 0x462   :  { %v1453_v34 = vsel %vm777_vm5, %v1439_v40, %v1452_v23  ;;  %v1369_v7 = vrot.slane %v1368_v32, 1 }
 0x463   :  { %v1440_v41 = vunpack.c.l.b16 %v1385_v24  ;;  %v1378_v62 = vpack.c.bf16 %v1322_v11, %v1322_v11  ;;  %v1447_v14 = vsel %vm779_vm6, %v1432_v57, %v1446_v60 }
 0x464   :  { %v1370_v52 = vadd.f32 %v1369_v7, %v1368_v32 }
 0x465   :  { %v1433_v29 = vunpack.c.l.b16 %v1378_v62  ;;  %v1454_v33 = vsel %vm779_vm6, %v1440_v41, %v1453_v34 }
 0x466   :  { %v1386_v15 = vpack.c.bf16 %v1370_v52, %v1370_v52 }
 0x467   :  { %v1448_v53 = vsel %vm781_vm7, %v1433_v29, %v1447_v14 }
 0x468   :  { %v1441_v25 = vunpack.c.l.b16 %v1386_v15 }
 0x46a   :  { %v1455_v8 = vsel %vm781_vm7, %v1441_v25, %v1454_v33 }
 0x46b   :  { %v1456_v13 = vpack.c.b16 %v1455_v8, %v1448_v53 }
 0x46d   :  { %1665 = vmatmul.mubr.bf16.vlgmr.msra.gmra.mxu0 %v1456_v13 }
 0x52d   :  { %v1540_v47 = vpop.f32.mrf.mxu0 }
 0x52e   :  { %v1541_v49 = vadd.f32 %v1601_v46, %v1540_v47 }
 0x52f   :  { %v1666_v63 = vpop.f32.mrf.mxu0 }
 0x530   :  { %v1549_v36 = vmul.f32 %v1760_v5, %v1541_v49  ;;  %1555 = vst [vmem:[#allocation11 + $0x20] sm:$0xff] %v1541_v49 }
 0x531   :  { %v1543_v42 = vpop.f32.mrf.mxu0 }
 0x532   :  { %1552 = vst [vmem:[#allocation11 + $0x10] sm:$0xff] %v1549_v36  ;;  %v1544_v51 = vadd.f32 %v1601_v46, %v1543_v42 }
 0x533   :  { %v1667_v16 = vpop.f32.mrf.mxu0 }
 0x534   :  { %v1550_v28 = vmul.f32 %v1761_v54, %v1544_v51  ;;  %1556 = vst [vmem:[#allocation11 + $0x28] sm:$0xff] %v1544_v51 }
 0x536   :  { %1553 = vst [vmem:[#allocation11 + $0x18] sm:$0xff] %v1550_v28 }
 0x537   :  { %1873 = shalt.err (!%p1870_p1)
}
 0x538   :  { %1568 = dma.vmem_to_hbm [thread:$0]  %s1563_s14, 768, %s2427_s8, [#allocation4], %s1892_s10, %s1892_s10, %s1893_s11  }
 0x539   :  { %1888 = dma.done.wait [#allocation4], 768  }
 0x53a   :  { %1889 = vsyncadd [#allocation4], 4294966528 }
 0x53b   :  { %1572 = vsyncpa [#allocation3], 1 }
 0x53c   :  { %1573 = vsyncpa [#allocation6], 1 }
 0x53d   :  { %1574 = vsyncpa [#allocation9], 1 }
 0x53e   :  { %1575 = vsyncpa [#allocation4], 1 }

</bundles_post_ra>
